<compile_context>
chip_gen: v7x
topology: tpu7x:2x2x1
jax: 0.10.0
libtpu: 0.0.40
codegen_flags: <defaults>
</compile_context>

<pallas_src>
import functools

import jax
import jax.numpy as jnp
import numpy as np
from jax.experimental import pallas as pl
from jax.experimental.pallas import tpu as pltpu

_LANES = 128
_SUBLANES = 8


def _kl_partial_kernel(x_ref, t_ref, out_ref, acc_ref, *, rows_total):
    # x_ref / t_ref : (tile, 128) tile of the flattened histograms
    # out_ref       : (8, 128) per-split partial sums (written once per split)
    # acc_ref       : (8, 128) resident f32 accumulator
    k = pl.program_id(1)

    @pl.when(k == 0)
    def _init():
        acc_ref[...] = jnp.zeros_like(acc_ref)

    x = x_ref[...].astype(jnp.float32)   # F.kl_div "input"  (hist1)
    t = t_ref[...].astype(jnp.float32)   # F.kl_div "target" (hist2)
    tile = x.shape[0]

    # Global (unclamped) row index of every element of this block.  Blocks
    # whose unclamped index lies past the end of the array (duplicates from
    # the clamped index_map) and the ragged tail of the last real block are
    # fully masked out against the static row count.
    block_idx = pl.program_id(0) * pl.num_programs(1) + k
    row = block_idx * tile + jax.lax.broadcasted_iota(jnp.int32, x.shape, 0)
    valid = (row < rows_total) & (t > 0.0)

    # Pointwise kl_div term: where(t > 0, t * (log(t) - x), 0).
    safe_t = jnp.where(t > 0.0, t, 1.0)          # avoid log(0) hygiene
    elem = jnp.where(valid, t * (jnp.log(safe_t) - x), 0.0)

    # Pure vreg-aligned VADD reduction: collapse groups of 8 sublane rows.
    acc_ref[...] += elem.reshape(tile // _SUBLANES, _SUBLANES, _LANES).sum(axis=0)

    @pl.when(k == pl.num_programs(1) - 1)
    def _finalize():
        out_ref[...] = acc_ref[...]


def kl_coefficient(hist1, hist2, *, tile_rows=4096, small_numel_threshold=1 << 17):
    """Forward of KLCoefficient: 1.0 + F.kl_div(hist1, hist2, reduction='mean')."""
    assert hist1.shape == hist2.shape, "hist1 / hist2 must have the same shape"
    numel = int(np.prod(hist1.shape))
    assert numel > 0

    x = jnp.ravel(hist1)
    t = jnp.ravel(hist2)

    # ---- Small-input fast path: fixed pallas_call costs dominate tiny inputs.
    if numel < small_numel_threshold:
        xf = x.astype(jnp.float32)
        tf = t.astype(jnp.float32)
        elem = jnp.where(tf > 0.0,
                         tf * (jnp.log(jnp.where(tf > 0.0, tf, 1.0)) - xf),
                         0.0)
        return 1.0 + jnp.sum(elem) / numel

    # ---- Pallas streaming-reduction path.
    # Pad only to the next multiple of 128 lanes (skipped when already
    # aligned); padded tail has target == 0 so it contributes exactly 0.
    rows_total = -(-numel // _LANES)
    pad = rows_total * _LANES - numel
    if pad:
        x = jnp.pad(x, (0, pad))
        t = jnp.pad(t, (0, pad))
    x = x.reshape(rows_total, _LANES)
    t = t.reshape(rows_total, _LANES)

    # Row tile: as large as requested, multiple of 8 sublanes, <= rows_total.
    tile = max(_SUBLANES, (min(tile_rows, rows_total) // _SUBLANES) * _SUBLANES)
    n_blocks = -(-rows_total // tile)

    # Leading "parallel" axis: shards the stream across both TensorCores on
    # v7x; effectively free on single-TC v5e/v6e.
    splits = 2 if n_blocks >= 2 else 1
    kps = -(-n_blocks // splits)     # row tiles per split

    def in_map(s, k):
        # Clamp so duplicate overhang blocks stay in range; the kernel masks
        # them to zero via the unclamped global row index.
        return (jnp.minimum(s * kps + k, n_blocks - 1), 0)

    kernel = functools.partial(_kl_partial_kernel, rows_total=rows_total)

    partials = pl.pallas_call(
        kernel,
        out_shape=jax.ShapeDtypeStruct((splits * _SUBLANES, _LANES), jnp.float32),
        grid=(splits, kps),
        in_specs=[
            pl.BlockSpec((tile, _LANES), in_map),
            pl.BlockSpec((tile, _LANES), in_map),
        ],
        out_specs=pl.BlockSpec((_SUBLANES, _LANES), lambda s, k: (s, 0)),
        scratch_shapes=[pltpu.VMEM((_SUBLANES, _LANES), jnp.float32)],
        compiler_params=pltpu.CompilerParams(
            dimension_semantics=("parallel", "arbitrary"),
            vmem_limit_bytes=32 * 1024 * 1024,
        ),
    )(x, t)

    kl = jnp.sum(partials) / numel
    return 1.0 + kl      # reproduces `1.0 / 1 + kl` (== 1.0 + kl) verbatim


def _reference(h1, h2):
    h1 = h1.astype(jnp.float32)
    h2 = h2.astype(jnp.float32)
    elem = jnp.where(h2 > 0.0,
                     h2 * (jnp.log(jnp.where(h2 > 0.0, h2, 1.0)) - h1),
                     0.0)
    return 1.0 + jnp.sum(elem) / h2.size


if __name__ == "__main__":
    key = jax.random.PRNGKey(0)
    k1, k2, k3, k4, k5, k6 = jax.random.split(key, 6)

    def make_hists(ka, kb, shape):
        a = jax.random.uniform(ka, shape, dtype=jnp.float32)
        a = a / jnp.sum(a, axis=-1, keepdims=True)
        b = jax.random.uniform(kb, shape, dtype=jnp.float32)
        b = b / jnp.sum(b, axis=-1, keepdims=True)
        return a, b

    # Case 1: production-like 2 x 100-bin histograms -> small-input fast path.
    h1, h2 = make_hists(k1, k2, (2, 100))
    out_small = kl_coefficient(h1, h2)
    jax.block_until_ready(out_small)
    np.testing.assert_allclose(np.asarray(out_small), np.asarray(_reference(h1, h2)),
                               rtol=1e-5, atol=1e-6)

    # Case 2: force the Pallas path on a small, deliberately awkward size
    # (numel % 128 != 0, rows % tile != 0, odd block count) to exercise the
    # lane pad, ragged-block mask, clamped overhang block and the 2-way split.
    g1, g2 = make_hists(k3, k4, (250, 200))
    out_ragged = kl_coefficient(g1, g2, tile_rows=128, small_numel_threshold=0)
    jax.block_until_ready(out_ragged)
    np.testing.assert_allclose(np.asarray(out_ragged), np.asarray(_reference(g1, g2)),
                               rtol=1e-5, atol=1e-5)

    # Case 3: default configuration (tile_rows=4096) on an aligned input.
    f1, f2 = make_hists(k5, k6, (1024, 512))
    out_large = kl_coefficient(f1, f2)
    jax.block_until_ready(out_large)
    np.testing.assert_allclose(np.asarray(out_large), np.asarray(_reference(f1, f2)),
                               rtol=1e-5, atol=1e-5)

    print("KERNEL_OK")
</pallas_src>

<mosaic_0001>
module attributes {stable_mosaic.version = 11 : i64} {
  func.func @_kl_partial_kernel(%arg0: i32, %arg1: i32, %arg2: memref<128x128xf32, #tpu.memory_space<vmem>>, %arg3: memref<128x128xf32, #tpu.memory_space<vmem>>, %arg4: memref<8x128xf32, #tpu.memory_space<vmem>>, %arg5: memref<8x128xf32, #tpu.memory_space<vmem>>) attributes {dimension_semantics = [#tpu.dimension_semantics<parallel>, #tpu.dimension_semantics<arbitrary>], iteration_bounds = array<i64: 2, 2>, scalar_prefetch = 0 : i64, scratch_operands = 1 : i64, tpu.core_type = #tpu.core_type<tc>, window_params = [{transform_indices = @transform_0, window_bounds = array<i64: 128, 128>}, {transform_indices = @transform_1, window_bounds = array<i64: 128, 128>}, {transform_indices = @transform_2, window_bounds = array<i64: 8, 128>}]} {
    %c0_i32 = arith.constant 0 : i32
    %0 = arith.cmpi eq, %arg1, %c0_i32 : i32
    %1 = arith.extui %0 : i1 to i32
    %c0_i32_0 = arith.constant 0 : i32
    %2 = arith.cmpi ne, %1, %c0_i32_0 : i32
    scf.if %2 {
      %cst_13 = arith.constant 0.000000e+00 : f32
      %33 = vector.broadcast %cst_13 : f32 to vector<8x128xf32>
      %c0_14 = arith.constant 0 : index
      %c0_15 = arith.constant 0 : index
      %34 = vector.load %arg5[%c0_14, %c0_15] : memref<8x128xf32, #tpu.memory_space<vmem>>, vector<8x128xf32>
      tpu.vector_store %arg5[%c0_14, %c0_15], %33 {strides = array<i32>} : memref<8x128xf32, #tpu.memory_space<vmem>>, vector<8x128xf32>,
    } else {
    }
    %c0 = arith.constant 0 : index
    %c0_1 = arith.constant 0 : index
    %3 = vector.load %arg2[%c0, %c0_1] : memref<128x128xf32, #tpu.memory_space<vmem>>, vector<128x128xf32>
    %c0_2 = arith.constant 0 : index
    %c0_3 = arith.constant 0 : index
    %4 = vector.load %arg3[%c0_2, %c0_3] : memref<128x128xf32, #tpu.memory_space<vmem>>, vector<128x128xf32>
    %c2_i32 = arith.constant 2 : i32
    %5 = arith.muli %arg0, %c2_i32 : i32
    %6 = arith.addi %5, %arg1 : i32
    %c128_i32 = arith.constant 128 : i32
    %7 = arith.muli %6, %c128_i32 : i32
    %8 = tpu.iota {dimensions = array<i32: 0>} : vector<128x128xi32>
    %9 = vector.broadcast %7 : i32 to vector<128x128xi32>
    %10 = arith.addi %9, %8 : vector<128x128xi32>
    %c391_i32 = arith.constant 391 : i32
    %11 = vector.broadcast %c391_i32 : i32 to vector<128x128xi32>
    %12 = arith.cmpi slt, %10, %11 : vector<128x128xi32>
    %cst = arith.constant 0.000000e+00 : f32
    %13 = vector.broadcast %cst : f32 to vector<128x128xf32>
    %14 = arith.cmpf ogt, %4, %13 : vector<128x128xf32>
    %15 = arith.andi %12, %14 : vector<128x128xi1>
    %cst_4 = arith.constant 0.000000e+00 : f32
    %16 = vector.broadcast %cst_4 : f32 to vector<128x128xf32>
    %17 = arith.cmpf ogt, %4, %16 : vector<128x128xf32>
    %cst_5 = arith.constant 1.000000e+00 : f32
    %18 = vector.broadcast %cst_5 : f32 to vector<128x128xf32>
    %19 = arith.select %17, %4, %18 : vector<128x128xi1>, vector<128x128xf32>
    %20 = math.log %19 : vector<128x128xf32>
    %21 = arith.subf %20, %3 : vector<128x128xf32>
    %22 = arith.mulf %4, %21 : vector<128x128xf32>
    %cst_6 = arith.constant 0.000000e+00 : f32
    %23 = vector.broadcast %cst_6 : f32 to vector<128x128xf32>
    %24 = arith.select %15, %22, %23 : vector<128x128xi1>, vector<128x128xf32>
    %c0_7 = arith.constant 0 : index
    %c0_8 = arith.constant 0 : index
    %25 = vector.load %arg5[%c0_7, %c0_8] : memref<8x128xf32, #tpu.memory_space<vmem>>, vector<8x128xf32>
    %26 = vector.shape_cast %24 : vector<128x128xf32> to vector<16x8x128xf32>
    %cst_9 = arith.constant dense<0.000000e+00> : vector<8x128xf32>
    %27 = vector.multi_reduction <add>, %26, %cst_9 [0] : vector<16x8x128xf32> to vector<8x128xf32>
    %28 = arith.addf %25, %27 : vector<8x128xf32>
    %c0_10 = arith.constant 0 : index
    %c0_11 = arith.constant 0 : index
    %29 = vector.load %arg5[%c0_10, %c0_11] : memref<8x128xf32, #tpu.memory_space<vmem>>, vector<8x128xf32>
    tpu.vector_store %arg5[%c0_10, %c0_11], %28 {strides = array<i32>} : memref<8x128xf32, #tpu.memory_space<vmem>>, vector<8x128xf32>,
    %c1_i32 = arith.constant 1 : i32
    %30 = arith.cmpi eq, %arg1, %c1_i32 : i32
    %31 = arith.extui %30 : i1 to i32
    %c0_i32_12 = arith.constant 0 : i32
    %32 = arith.cmpi ne, %31, %c0_i32_12 : i32
    scf.if %32 {
      %c0_13 = arith.constant 0 : index
      %c0_14 = arith.constant 0 : index
      %33 = vector.load %arg5[%c0_13, %c0_14] : memref<8x128xf32, #tpu.memory_space<vmem>>, vector<8x128xf32>
      %c0_15 = arith.constant 0 : index
      %c0_16 = arith.constant 0 : index
      %34 = vector.load %arg4[%c0_15, %c0_16] : memref<8x128xf32, #tpu.memory_space<vmem>>, vector<8x128xf32>
      tpu.vector_store %arg4[%c0_15, %c0_16], %33 {strides = array<i32>} : memref<8x128xf32, #tpu.memory_space<vmem>>, vector<8x128xf32>,
    } else {
    }
    return
  }
  func.func @transform_0(%arg0: i32, %arg1: i32) -> (i32, i32) {
    %c2_i32 = arith.constant 2 : i32
    %0 = arith.muli %arg0, %c2_i32 : i32
    %1 = arith.addi %0, %arg1 : i32
    %c3_i32 = arith.constant 3 : i32
    %2 = arith.minsi %1, %c3_i32 : i32
    %c0_i32 = arith.constant 0 : i32
    %c0_i32_0 = arith.constant 0 : i32
    return %2, %c0_i32 : i32, i32
  }
  func.func @transform_1(%arg0: i32, %arg1: i32) -> (i32, i32) {
    %c2_i32 = arith.constant 2 : i32
    %0 = arith.muli %arg0, %c2_i32 : i32
    %1 = arith.addi %0, %arg1 : i32
    %c3_i32 = arith.constant 3 : i32
    %2 = arith.minsi %1, %c3_i32 : i32
    %c0_i32 = arith.constant 0 : i32
    %c0_i32_0 = arith.constant 0 : i32
    return %2, %c0_i32 : i32, i32
  }
  func.func @transform_2(%arg0: i32, %arg1: i32) -> (i32, i32) {
    %c0_i32 = arith.constant 0 : i32
    %c0_i32_0 = arith.constant 0 : i32
    return %arg0, %c0_i32 : i32, i32
  }
}

</mosaic_0001>

<bundles_post_ra>
// kernel: tpu_custom_call.1
= control target key start
LH: loop header
LB: loop body
LE: loop exit
PB: predicated region body
PF: predicated region fallthrough
CT: control target
= control target key end

     0   :  { %7 = vsyncpa [#allocation4], 0  ;;  %s1610_s0 = inlined_call_operand.hbm [shape: f32[391,128], index: 0, kind: input, shape index: {}]   ;;  %s1611_s1 = inlined_call_operand.hbm [shape: f32[391,128], index: 1, kind: input, shape index: {}]   ;;  %s1612_s2 = inlined_call_operand.hbm [shape: f32[16,128], index: 2, kind: output, shape index: {}]  }
   0x1   :  { %9 = vsyncpa [#allocation4 + $0x1], 0 }
   0x2   :  { %10 = vsyncpa [#allocation7], 0 }
   0x3   :  { %12 = vsyncpa [#allocation7 + $0x1], 0 }
   0x4   :  { %13 = vsyncpa [#allocation5], 0 }
   0x5   :  { %15 = vsyncpa [#allocation5 + $0x1], 0  ;;  %s1007_s9 = smov 0   ;;  %s1009_s10 = smov 0  }
   0x6   :  { %s1011_s11 = smov 0   ;;  %s1013_s12 = smov 0  }
   0x7   :  { %s1015_s13 = smov 0   ;;  %s1017_s14 = smov 0  }
   0x8   :  { %s1019_s15 = smov 0   ;;  %s1021_s16 = smov 0  }
   0x9   :  { %s1023_s17 = smov 0   ;;  %s1025_s18 = smov 0  }
   0xa   :  { %s1027_s19 = smov 0  }
   0xb LB: > { %1623 = sst [smem:[#allocation12_spill]] %s974_s17  ;;  %s628_s20 = sadd.s32 4294967295, %s982_s19   ;;  %s982_s19 = sphi %s1027_s19, %s21_s19   ;;  %s978_s18 = sphi %s1025_s18, %s1667_s18   ;;  %s974_s17 = sphi %s1023_s17, %s1666_s17   ;;  %s970_s16 = sphi %s1021_s16, %s1665_s16   ;;  %s966_s15 = sphi %s1019_s15, %s1664_s15   ;;  %s962_s14 = sphi %s1017_s14, %s1673_s14   ;;  %s958_s13 = sphi %s1015_s13, %s1672_s13   ;;  %s954_s12 = sphi %s1013_s12, %s1671_s12   ;;  %s950_s11 = sphi %s1011_s11, %s1670_s11   ;;  %s946_s10 = sphi %s1009_s10, %s1669_s10   ;;  %s942_s9 = sphi %s1007_s9, %s1668_s9  }
   0xc   : > { %1624 = sst [smem:[#allocation13_spill]] %s978_s18  ;;  %s629_s21 = sadd.s32 4294967294, %s982_s19  }
   0xd   : > { %s30_s22 = sadd.s32 1, %s974_s17  ;;  %s33_s23 = sadd.s32 1, %s978_s18 }
   0xe   : > { %p31_p0 = scmp.ge.s32.totalorder %s30_s22, 2  ;;  %s630_s24 = sshll.u32 %s978_s18, 1 }
   0xf   : > { %s38_s25 = sadd.s32 %s974_s17, %s630_s24  ;;  %s48_s26 = sadd.s32 1, %s962_s14 }
  0x10   : > { %s1675_s22 = smov (%p31_p0, %s30_s22), 0  ;;  %s1677_s23 = smov (!%p31_p0, %s33_s23), %s978_s18 }
  0x11   : > { %1625 = sst [smem:[#allocation14_spill]] %s1675_s22  ;;  %p39_p1 = scmp.lt.s32.totalorder %s38_s25, 3 }
  0x12   : > { %p55_p2 = scmp.ne.s32.totalorder %s962_s14, %s958_s13  ;;  %p35_p3 = scmp.ge.s32.totalorder %s1677_s23, 2 }
  0x13   : > { %p56_p4 = scmp.eq.s32.totalorder %s982_s19, 0  ;;  %s1679_s25 = smov (!%p39_p1, %s38_s25), 3 }
  0x14   : > { %s1681_s23 = smov (%p35_p3, %s1677_s23), 0  ;;  %p61_p6 = scmp.ne.s32.totalorder %s958_s13, %s954_s12 }
  0x15   : > { %1626 = sst [smem:[#allocation15_spill]] %s1681_s23  ;;  %p1079_p5 = por %p56_p4, %p55_p2 }
  0x16   : > { %s631_s28 = sshll.u32 %s1681_s23, 1  ;;  %p62_p7 = scmp.eq.s32.totalorder %s628_s20, 0 }
  0x17   : > { %s42_s29 = sadd.s32 %s631_s28, %s1675_s22  ;;  %s105_s30 = ssub.s32 %s978_s18, %s1681_s23 }
  0x18   : > { %p43_p8 = scmp.lt.s32.totalorder %s42_s29, 3  ;;  %p1091_p9 = por %p62_p7, %p61_p6 }
  0x19   : > { %p106_p10 = scmp.eq.s32.totalorder %s105_s30, 0  ;;  %s108_s4 = sadd.s32 1, %s950_s11 }
  0x1a   : > { %s1683_s29 = smov (!%p43_p8, %s42_s29), 3  ;;  %p118_p11 = scmp.ne.s32.totalorder %s950_s11, %s946_s10 }
  0x1b   : > { %s1097_s5 = scalar_select %p106_p10, %s950_s11, %s108_s4  }
  0x1c   : > { %s45_s6 = ssub.s32 %s1679_s25, %s1683_s29  ;;  %p119_p13 = scmp.eq.s32.totalorder %s628_s20, 3 }
  0x1d   : > { %p46_p12 = scmp.eq.s32.totalorder %s45_s6, 0  ;;  %p124_p0 = scmp.ne.s32.totalorder %s946_s10, %s942_s9 }
  0x1e   : > { %p125_p1 = scmp.eq.s32.totalorder %s629_s21, 3  ;;  %p1111_p2 = por %p119_p13, %p118_p11 }
  0x1f   : > { %s1109_s7 = scalar_select %p46_p12, %s962_s14, %s48_s26  }
  0x20   : > { %s1629_s8 = scalar_select %p1111_p2, 1, 0 }
  0x21   : > { %p1115_p3 = por %p125_p1, %p124_p0  ;;  %p635_p4 = scmp.ge.s32.totalorder %s982_s19, 4 }
  0x23   : > { %s1630_s12 = scalar_select %p1115_p3, 1, 0 }
  0x24   : > { %141 = sbr.rel (%p635_p4) target bundleno = 113 (0x71), region = 16 }
  0x2b   : > { %144 = sbr.rel (!%p1079_p5) target bundleno = 78 (0x4e), region = 20  ;;  %s145_s20 = sand.u32 (%p1079_p5), 1, %s962_s14  }
  0x2c   : > { %s638_s21 = sshll.u32 (%p1079_p5), %s1679_s25, 4  ;;  %s636_s24 = sshll.u32 (%p1079_p5), %s145_s20, 7 }
  0x2d   : > { %s155_s26 = ssub.s32 (%p1079_p5), 49, %s638_s21  ;;  %s1127_s30 = scalar_lea.sflag (%p1079_p5), [#allocation4], %s145_s20 }
  0x2e   : > { %p156_p6 = scmp.lt.s32.totalorder (%p1079_p5), %s155_s26, 16  ;;  %s149_s4 = scalar_lea.vmem (%p1079_p5), [#allocation3], %s636_s24 }
  0x32   : > { %s1685_s26 = smov (!%p156_p6, %s155_s26), 16 }
  0x33   : > { %s1124_s28 = sshll.u32 %s1685_s26, 7 }
  0x34   : > { %s160_s29 = ssub.s32 2048, %s1124_s28 }
  0x35   : > { %161 = vsyncadd %s1127_s30, %s160_s29  ;;  %p640_p7 = scmp.ne.s32.totalorder %s1124_s28, 0  ;;  %s664_s6 = sshll.u32 %s1679_s25, 11 }
  0x36   : > { %s1135_s21 = scalar_lea.hbm %s1610_s0, %s664_s6  ;;  %s166_s20 = sshll.u32 %s149_s4, 4  ;;  %s1137_s20 = int_to_ptr.vmem [resolvable:$true] %s166_s20 }
  0x37   : > { %s800_s24 = scalar_lea.hbm %s1135_s21, %s1124_s28  ;;  %s804_s18 = scalar_lea.hbm %s1610_s0, 6272 }
  0x38   : > { %p801_p8 = scmp.ne.s32.totalorder %s1135_s21, %s800_s24  ;;  %p805_p12 = scmp.lt.u32.totalorder %s1135_s21, %s1610_s0 }
  0x39   : > { %p806_p13 = scmp.lt.u32.totalorder %s804_s18, %s800_s24  ;;  %p808_p1 = scmp.lt.u32.totalorder %s800_s24, %s1135_s21 }
  0x3a   : > { %p802_p10 = pnand %p801_p8, %p640_p7 }
  0x3b   : > { %p807_p0 = por %p806_p13, %p805_p12 }
  0x3c   : > { %p803_p11 = pneg %p802_p10 }
  0x3d   : > { %p809_p4 = por %p808_p1, %p807_p0 }
  0x3f   : > { %p810_p6 = pnand %p809_p4, %p803_p11 }
  0x41   : > { %813 = shalt.err (!%p810_p6)
}
  0x42   : > { %s814_s23 = scalar_lea.vmem %s1137_s20, %s1124_s28  ;;  %s984_s4 = smov [#allocation3]  }
  0x43   : > { %p815_p8 = scmp.ne.s32.totalorder %s1137_s20, %s814_s23  ;;  %s818_s6 = sshll.u32 %s984_s4, 4  ;;  %s819_s6 = int_to_ptr.vmem [resolvable:$false] %s818_s6 }
  0x44   : > { %s820_s17 = scalar_lea.vmem %s819_s6, 4096  ;;  %p821_p2 = scmp.lt.s32.totalorder %s1137_s20, %s819_s6 }
  0x45   : > { %p816_p10 = pnand %p815_p8, %p640_p7  ;;  %p822_p12 = scmp.lt.s32.totalorder %s820_s17, %s814_s23 }
  0x47   : > { %p817_p3 = pneg %p816_p10  ;;  %p823_p13 = por %p822_p12, %p821_p2 }
  0x49   : > { %p824_p0 = pnand %p823_p13, %p817_p3 }
  0x4b   : > { %827 = shalt.err (!%p824_p0)
}
  0x4c   : > { %s985_s18 = smov 128   ;;  %s986_s24 = smov 8  }
  0x4d   : > { %172 = dma.hbm_to_vmem [thread:$0]  (%p640_p7), %s1135_s21, %s1124_s28, %s1137_s20, %s1127_s30, %s985_s18, %s985_s18, %s986_s24  }
  0x4e PF: > { %175 = sbr.rel (!%p1079_p5) target bundleno = 113 (0x71), region = 24  ;;  %s176_s26 = sand.u32 (%p1079_p5), 1, %s962_s14  }
  0x4f   : > { %s646_s29 = sshll.u32 (%p1079_p5), %s1679_s25, 4  ;;  %s644_s22 = sshll.u32 (%p1079_p5), %s176_s26, 7 }
  0x50   : > { %s186_s23 = ssub.s32 (%p1079_p5), 49, %s646_s29  ;;  %s1171_s17 = scalar_lea.sflag (%p1079_p5), [#allocation7], %s176_s26 }
  0x51   : > { %p187_p2 = scmp.lt.s32.totalorder (%p1079_p5), %s186_s23, 16  ;;  %s180_s28 = scalar_lea.vmem (%p1079_p5), [#allocation6], %s644_s22 }
  0x55   : > { %s1687_s23 = smov (!%p187_p2, %s186_s23), 16 }
  0x56   : > { %s1168_s4 = sshll.u32 %s1687_s23, 7 }
  0x57   : > { %s191_s6 = ssub.s32 2048, %s1168_s4 }
  0x58   : > { %192 = vsyncadd %s1171_s17, %s191_s6  ;;  %p648_p5 = scmp.ne.s32.totalorder %s1168_s4, 0  ;;  %s665_s27 = sshll.u32 %s1679_s25, 11 }
  0x59   : > { %s1179_s20 = scalar_lea.hbm %s1611_s1, %s665_s27  ;;  %s197_s18 = sshll.u32 %s180_s28, 4  ;;  %s1181_s18 = int_to_ptr.vmem [resolvable:$true] %s197_s18 }
  0x5a   : > { %s828_s24 = scalar_lea.hbm %s1179_s20, %s1168_s4  ;;  %s832_s25 = scalar_lea.hbm %s1611_s1, 6272 }
  0x5b   : > { %p829_p3 = scmp.ne.s32.totalorder %s1179_s20, %s828_s24  ;;  %p833_p1 = scmp.lt.u32.totalorder %s1179_s20, %s1611_s1 }
  0x5c   : > { %p834_p4 = scmp.lt.u32.totalorder %s832_s25, %s828_s24  ;;  %p836_p8 = scmp.lt.u32.totalorder %s828_s24, %s1179_s20 }
  0x5d   : > { %p830_p7 = pnand %p829_p3, %p648_p5 }
  0x5e   : > { %p835_p6 = por %p834_p4, %p833_p1 }
  0x5f   : > { %p831_p11 = pneg %p830_p7 }
  0x60   : > { %p837_p10 = por %p836_p8, %p835_p6 }
  0x62   : > { %p838_p12 = pnand %p837_p10, %p831_p11 }
  0x64   : > { %841 = shalt.err (!%p838_p12)
}
  0x65   : > { %s842_s6 = scalar_lea.vmem %s1181_s18, %s1168_s4  ;;  %s987_s28 = smov [#allocation6]  }
  0x66   : > { %p843_p13 = scmp.ne.s32.totalorder %s1181_s18, %s842_s6  ;;  %s846_s27 = sshll.u32 %s987_s28, 4  ;;  %s847_s27 = int_to_ptr.vmem [resolvable:$false] %s846_s27 }
  0x67   : > { %s848_s30 = scalar_lea.vmem %s847_s27, 4096  ;;  %p849_p3 = scmp.lt.s32.totalorder %s1181_s18, %s847_s27 }
  0x68   : > { %p844_p0 = pnand %p843_p13, %p648_p5  ;;  %p850_p7 = scmp.lt.s32.totalorder %s848_s30, %s842_s6 }
  0x6a   : > { %p845_p2 = pneg %p844_p0  ;;  %p851_p1 = por %p850_p7, %p849_p3 }
  0x6c   : > { %p852_p4 = pnand %p851_p1, %p845_p2 }
  0x6e   : > { %855 = shalt.err (!%p852_p4)
}
  0x6f   : > { %s988_s21 = smov 128   ;;  %s989_s24 = smov 8  }
  0x70   : > { %203 = dma.hbm_to_vmem [thread:$0]  (%p648_p5), %s1179_s20, %s1168_s4, %s1181_s18, %s1171_s17, %s988_s21, %s988_s21, %s989_s24  }
  0x71 PF: > { %p652_p11 = scmp.ge.s32.totalorder %s982_s19, 1  ;;  %p205_p6 = scmp.lt.s32.totalorder %s982_s19, 5 }
  0x73   : > { %p206_p8 = pnand %p652_p11, %p205_p6 }
  0x74   : > { %s211_s26 = sand.u32 (!%p206_p8), 1, %s958_s13  }
  0x75   : > { %209 = sbr.rel (%p206_p8) target bundleno = 228 (0xe4), region = 28  ;;  %s653_s29 = sshll.u32 (!%p206_p8), %s211_s26, 7 }
  0x76   : > { %s212_s25 = scalar_lea.sflag (!%p206_p8), [#allocation4], %s211_s26  ;;  %s1211_s22 = scalar_lea.vmem (!%p206_p8), [#allocation3], %s653_s29 }
  0x7c   : > { %929 = dma.done.wait (%p1091_p9), %s212_s25, 2048  }
  0x7d   : > { %931 = vsyncadd (%p1091_p9), %s212_s25, 4294965248  ;;  %s221_s4 = scalar_lea.sflag [#allocation7], %s211_s26  ;;  %s1217_s17 = scalar_lea.vmem [#allocation6], %s653_s29 }
  0x7e   : > { %933 = dma.done.wait (%p1091_p9), %s221_s4, 2048  }
  0x7f   : > { %935 = vsyncadd (%p1091_p9), %s221_s4, 4294965248  ;;  %s247_s20 = sand.u32 1, %s946_s10   ;;  %p656_p5 = scmp.ne.s32.totalorder %s966_s15, 0 }
  0x80   : > { %s1226_s18 = sshll.u32 %s247_s20, 3  ;;  %v990_v0 = vmov (!%p656_p5), 0.0  }
  0x81   : > { %s249_s23 = scalar_lea.vmem [#allocation8], %s1226_s18  ;;  %271 = sbr.rel (%p656_p5) target bundleno = 136 (0x88), region = 40  ;;  %272 = vst [vmem:[#allocation2] sm:$0xff] (!%p656_p5), %v990_v0 }
  0x88 PF: > { %v1231_v1 = vld [vmem:[%s1217_s17] sm:$0xff]  ;;  %v1234_v2 = vld [vmem:[%s1217_s17 + $0x8] sm:$0xff]  ;;  %v1237_v3 = vld [vmem:[%s1217_s17 + $0x10] sm:$0xff]  ;;  %s657_s3 = sshll.u32 %s970_s16, 1  ;;  %v308_v12 = vlaneseq  ;;  %p659_p9 = scmp.ne.s32.totalorder %s966_s15, 1 }
  0x89   : > { %v1240_v4 = vld [vmem:[%s1217_s17 + $0x18] sm:$0xff]  ;;  %vm358_vm0 = vcmp.gt.f32.partialorder %v1231_v1, 0.0  ;;  %vm359_vm1 = vcmp.gt.f32.partialorder %v1234_v2, 0.0  ;;  %v1245_v5 = vld [vmem:[%s1217_s17 + $0x20] sm:$0xff]  ;;  %vm360_vm2 = vcmp.gt.f32.partialorder %v1237_v3, 0.0  ;;  %v1253_v7 = vld [vmem:[%s1217_s17 + $0x28] sm:$0xff]  ;;  %s306_s6 = sadd.s32 %s966_s15, %s657_s3 }
  0x8a   : > { %vm361_vm3 = vcmp.gt.f32.partialorder %v1240_v4, 0.0  ;;  %v390_v6 = vsel %vm358_vm0, %v1231_v1, 1.0  ;;  %v391_v8 = vsel %vm359_vm1, %v1234_v2, 1.0  ;;  %vm362_vm4 = vcmp.gt.f32.partialorder %v1245_v5, 0.0  ;;  %v1264_v10 = vld [vmem:[%s1217_s17 + $0x30] sm:$0xff]  ;;  %v1272_v13 = vld [vmem:[%s1217_s17 + $0x38] sm:$0xff] }
  0x8b   : > { %v392_v9 = vsel %vm360_vm2, %v1237_v3, 1.0  ;;  %v393_v11 = vsel %vm361_vm3, %v1240_v4, 1.0  ;;  %768 = vlog2.f32 %v390_v6  ;;  %vm363_vm5 = vcmp.gt.f32.partialorder %v1253_v7, 0.0  ;;  %v1279_v15 = vld [vmem:[%s1217_s17 + $0x40] sm:$0xff]  ;;  %s658_s28 = sshll.u32 %s306_s6, 7  ;;  %v1288_v18 = vld [vmem:[%s1217_s17 + $0x48] sm:$0xff] }
  0x8c   : > { %770 = vlog2.f32 %v391_v8  ;;  %v394_v14 = vsel %vm362_vm4, %v1245_v5, 1.0  ;;  %vm364_vm6 = vcmp.gt.f32.partialorder %v1264_v10, 0.0  ;;  %v395_v16 = vsel %vm363_vm5, %v1253_v7, 1.0  ;;  %v1297_v21 = vld [vmem:[%s1217_s17 + $0x50] sm:$0xff]  ;;  %v1306_v26 = vld [vmem:[%s1217_s17 + $0x58] sm:$0xff]  ;;  %v273_v32 = vld [vmem:[%s1211_s22] sm:$0xff] }
  0x8d   : > { %772 = vlog2.f32 %v392_v9  ;;  %v1284_v17 = vshrl.u32 %v308_v12, 7  ;;  %vm365_vm7 = vcmp.gt.f32.partialorder %v1272_v13, 0.0  ;;  %v396_v19 = vsel %vm364_vm6, %v1264_v10, 1.0  ;;  %v1319_v36 = vld [vmem:[%s1217_s17 + $0x60] sm:$0xff]  ;;  %v274_v42 = vld [vmem:[%s1211_s22 + $0x8] sm:$0xff]  ;;  %v275_v51 = vld [vmem:[%s1211_s22 + $0x10] sm:$0xff] }
  0x8e   : > { %774 = vlog2.f32 %v393_v11  ;;  %v1293_v20 = vstv %s658_s28  ;;  %vm1621_vm8 = vcmp.gt.f32.partialorder %v1279_v15, 0.0  ;;  %v397_v22 = vsel %vm365_vm7, %v1272_v13, 1.0  ;;  %v1335_v45 = vld [vmem:[%s1217_s17 + $0x68] sm:$0xff]  ;;  %v1348_v54 = vld [vmem:[%s1217_s17 + $0x70] sm:$0xff]  ;;  %v1351_v55 = vld [vmem:[%s1217_s17 + $0x78] sm:$0xff] }
  0x8f   : > { %776 = vlog2.f32 %v394_v14  ;;  %v310_v23 = vadd.s32 8, %v1284_v17  ;;  %v311_v24 = vadd.s32 16, %v1284_v17  ;;  %vm1620_vm9 = vcmp.gt.f32.partialorder %v1288_v18, 0.0  ;;  %v276_v61 = vld [vmem:[%s1211_s22 + $0x18] sm:$0xff]  ;;  %v277_v8 = vld [vmem:[%s1211_s22 + $0x20] sm:$0xff] }
  0x90   : > { %778 = vlog2.f32 %v395_v16  ;;  %v312_v27 = vadd.s32 24, %v1284_v17  ;;  %v313_v28 = vadd.s32 32, %v1284_v17  ;;  %v326_v29 = vadd.s32 %v1293_v20, %v1284_v17 }
  0x91   : > { %780 = vlog2.f32 %v396_v19  ;;  %v398_v30 = vsel %vm1621_vm8, %v1279_v15, 1.0  ;;  %v314_v33 = vadd.s32 40, %v1284_v17  ;;  %vm1618_vm10 = vcmp.gt.f32.partialorder %v1297_v21, 0.0 }
  0x92   : > { %782 = vlog2.f32 %v397_v22  ;;  %v315_v37 = vadd.s32 48, %v1284_v17  ;;  %v1323_v38 = vadd.s32 56, %v1284_v17  ;;  %v399_v39 = vsel %vm1620_vm9, %v1288_v18, 1.0 }
  0x93   : > { %v1330_v43 = vadd.s32 64, %v1284_v17  ;;  %v327_v44 = vadd.s32 %v1293_v20, %v310_v23  ;;  %vm1619_vm11 = vcmp.gt.f32.partialorder %v1306_v26, 0.0  ;;  %784 = vlog2.f32 %v398_v30  ;;  %v278_v23 = vld [vmem:[%s1211_s22 + $0x28] sm:$0xff] }
  0x94   : > { %v1338_v46 = vadd.s32 72, %v1284_v17  ;;  %v328_v47 = vadd.s32 %v1293_v20, %v311_v24  ;;  %v400_v48 = vsel %vm1618_vm10, %v1297_v21, 1.0  ;;  %v329_v52 = vadd.s32 %v1293_v20, %v312_v27 }
  0x95   : > { %v769_v25 = vpop.eup %768  ;;  %vm1622_vm12 = vcmp.gt.f32.partialorder %v1319_v36, 0.0  ;;  %786 = vlog2.f32 %v399_v39  ;;  %v330_v56 = vadd.s32 %v1293_v20, %v313_v28  ;;  %v401_v57 = vsel %vm1619_vm11, %v1306_v26, 1.0 }
  0x96   : > { %v771_v31 = vpop.eup %770  ;;  %v407_v34 = vmul.f32 0.6931472, %v769_v25  ;;  %vm342_vm13 = vcmp.lt.s32.totalorder %v326_v29, 391  ;;  %vm343_vm14 = vcmp.lt.s32.totalorder %v327_v44, 391  ;;  %vm371_vm15 = vcmp.gt.f32.partialorder %v1335_v45, 0.0 }
  0x97   : > { %v773_v35 = vpop.eup %772  ;;  %v409_v40 = vmul.f32 0.6931472, %v771_v31  ;;  %788 = vlog2.f32 %v400_v48  ;;  %vm344_vm10 = vcmp.lt.s32.totalorder %v328_v47, 391  ;;  %v402_v62 = vsel %vm1622_vm12, %v1319_v36, 1.0  ;;  %vm1368_vm8 = vmand %vm342_vm13, %vm358_vm0 }
  0x98   : > { %v775_v41 = vpop.eup %774  ;;  %v411_v49 = vmul.f32 0.6931472, %v773_v35  ;;  %v438_v53 = vsub.f32 %v407_v34, %v273_v32  ;;  %vm372_vm11 = vcmp.gt.f32.partialorder %v1348_v54, 0.0  ;;  %vm373_vm9 = vcmp.gt.f32.partialorder %v1351_v55, 0.0  ;;  %vm1382_vm0 = vmand %vm343_vm14, %vm359_vm1  ;;  %v279_v32 = vld [vmem:[%s1211_s22 + $0x30] sm:$0xff] }
  0x99   : > { %v777_v50 = vpop.eup %776  ;;  %v413_v58 = vmul.f32 0.6931472, %v775_v41  ;;  %v439_v59 = vsub.f32 %v409_v40, %v274_v42  ;;  %790 = vlog2.f32 %v401_v57  ;;  %v403_v12 = vsel %vm371_vm15, %v1335_v45, 1.0  ;;  %vm1394_vm1 = vmand %vm344_vm10, %vm360_vm2  ;;  %v280_v41 = vld [vmem:[%s1211_s22 + $0x38] sm:$0xff]  ;;  %v281_v57 = vld [vmem:[%s1211_s22 + $0x40] sm:$0xff] }
  0x9a   : > { %v779_v60 = vpop.eup %778  ;;  %v415_v63 = vmul.f32 0.6931472, %v777_v50  ;;  %v440_v0 = vsub.f32 %v411_v49, %v275_v51  ;;  %v454_v9 = vmul.f32 %v438_v53, %v1231_v1  ;;  %v331_v24 = vadd.s32 %v1293_v20, %v314_v33 }
  0x9b   : > { %v781_v6 = vpop.eup %780  ;;  %v417_v14 = vmul.f32 0.6931472, %v779_v60  ;;  %v441_v16 = vsub.f32 %v413_v58, %v276_v61  ;;  %v455_v19 = vmul.f32 %v439_v59, %v1234_v2  ;;  %v332_v25 = vadd.s32 %v1293_v20, %v315_v37 }
  0x9c   : > { %v783_v22 = vpop.eup %782  ;;  %vm345_vm12 = vcmp.lt.s32.totalorder %v329_v52, 391  ;;  %792 = vlog2.f32 %v402_v62  ;;  %v404_v27 = vsel %vm372_vm11, %v1348_v54, 1.0  ;;  %v419_v28 = vmul.f32 0.6931472, %v781_v6 }
  0x9d   : > { %v442_v29 = vsub.f32 %v415_v63, %v277_v8  ;;  %v456_v30 = vmul.f32 %v440_v0, %v1237_v3  ;;  %v785_v31 = vpop.eup %784  ;;  %vm346_vm13 = vcmp.lt.s32.totalorder %v330_v56, 391  ;;  %v405_v33 = vsel %vm373_vm9, %v1351_v55, 1.0 }
  0x9e   : > { %794 = vlog2.f32 %v403_v12  ;;  %v470_v34 = vsel %vm1368_vm8, %v454_v9, 0.0  ;;  %v421_v35 = vmul.f32 0.6931472, %v783_v22  ;;  %v443_v37 = vsub.f32 %v417_v14, %v278_v23  ;;  %vm1413_vm8 = vmand %vm345_vm12, %vm361_vm3  ;;  %v283_v14 = vld [vmem:[%s1211_s22 + $0x50] sm:$0xff] }
  0x9f   : > { %v457_v39 = vmul.f32 %v441_v16, %v1240_v4  ;;  %v471_v3 = vsel %vm1382_vm0, %v455_v19, 0.0  ;;  %v787_v40 = vpop.eup %786  ;;  %v319_v42 = vadd.s32 80, %v1284_v17  ;;  %v333_v44 = vadd.s32 %v1293_v20, %v1323_v38  ;;  %vm1426_vm3 = vmand %vm346_vm13, %vm362_vm4 }
  0xa0   : > { %vm347_vm2 = vcmp.lt.s32.totalorder %v331_v24, 391  ;;  %796 = vlog2.f32 %v404_v27  ;;  %v423_v48 = vmul.f32 0.6931472, %v785_v31  ;;  %v444_v49 = vsub.f32 %v419_v28, %v279_v32  ;;  %v284_v28 = vld [vmem:[%s1211_s22 + $0x58] sm:$0xff] }
  0xa1   : > { %v458_v50 = vmul.f32 %v442_v29, %v1245_v5  ;;  %v472_v51 = vsel %vm1394_vm1, %v456_v30, 0.0  ;;  %v789_v53 = vpop.eup %788  ;;  %v334_v38 = vadd.s32 %v1293_v20, %v1330_v43  ;;  %vm348_vm10 = vcmp.lt.s32.totalorder %v332_v25, 391  ;;  %v282_v43 = vld [vmem:[%s1211_s22 + $0x48] sm:$0xff]  ;;  %vm1440_vm12 = vmand %vm347_vm2, %vm363_vm5 }
  0xa2   : > { %798 = vlog2.f32 %v405_v33  ;;  %v487_v52 = vadd.f32 %v471_v3, %v470_v34  ;;  %v425_v58 = vmul.f32 0.6931472, %v787_v40  ;;  %v445_v59 = vsub.f32 %v421_v35, %v280_v41  ;;  %vm1453_vm5 = vmand %vm348_vm10, %vm364_vm6  ;;  %v285_v35 = vld [vmem:[%s1211_s22 + $0x60] sm:$0xff] }
  0xa3   : > { %v459_v60 = vmul.f32 %v443_v37, %v1253_v7  ;;  %v473_v61 = vsel %vm1413_vm8, %v457_v39, 0.0  ;;  %v791_v62 = vpop.eup %790  ;;  %v320_v63 = vadd.s32 88, %v1284_v17  ;;  %v335_v5 = vadd.s32 %v1293_v20, %v1338_v46 }
  0xa4   : > { %vm349_vm4 = vcmp.lt.s32.totalorder %v333_v44, 391  ;;  %v488_v0 = vadd.f32 %v487_v52, %v472_v51  ;;  %v427_v6 = vmul.f32 0.6931472, %v789_v53  ;;  %v446_v8 = vsub.f32 %v423_v48, %v281_v57  ;;  %v286_v48 = vld [vmem:[%s1211_s22 + $0x68] sm:$0xff] }
  0xa5   : > { %v460_v9 = vmul.f32 %v444_v49, %v1264_v10  ;;  %v474_v11 = vsel %vm1426_vm3, %v458_v50, 0.0  ;;  %v321_v46 = vadd.s32 96, %v1284_v17  ;;  %v336_v7 = vadd.s32 %v1293_v20, %v319_v42  ;;  %vm1466_vm6 = vmand %vm349_vm4, %vm365_vm7 }
  0xa6   : > { %v793_v12 = vpop.eup %792  ;;  %vm350_vm14 = vcmp.lt.s32.totalorder %v334_v38, 391  ;;  %v489_v19 = vadd.f32 %v488_v0, %v473_v61  ;;  %v429_v22 = vmul.f32 0.6931472, %v791_v62  ;;  %v447_v23 = vsub.f32 %v425_v58, %v282_v43  ;;  %v288_v43 = vld [vmem:[%s1211_s22 + $0x78] sm:$0xff] }
  0xa7   : > { %v461_v24 = vmul.f32 %v445_v59, %v1272_v13  ;;  %v475_v1 = vsel %vm1440_vm12, %v459_v60, 0.0  ;;  %v322_v29 = vadd.s32 104, %v1284_v17  ;;  %v337_v10 = vadd.s32 %v1293_v20, %v320_v63 }
  0xa8   : > { %v795_v27 = vpop.eup %794  ;;  %vm351_vm0 = vcmp.lt.s32.totalorder %v335_v5, 391  ;;  %v490_v30 = vadd.f32 %v489_v19, %v474_v11  ;;  %v431_v31 = vmul.f32 0.6931472, %v793_v12  ;;  %v448_v32 = vsub.f32 %v427_v6, %v283_v14 }
  0xa9   : > { %v462_v2 = vmul.f32 %v446_v8, %v1279_v15  ;;  %v476_v33 = vsel %vm1453_vm5, %v460_v9, 0.0  ;;  %v323_v37 = vadd.s32 112, %v1284_v17  ;;  %v338_v13 = vadd.s32 %v1293_v20, %v321_v46 }
  0xaa   : > { %v797_v34 = vpop.eup %796  ;;  %vm352_vm13 = vcmp.lt.s32.totalorder %v336_v7, 391  ;;  %vm1647_vm7 = vcmp.gt.f32.partialorder %v1279_v15, 0.0  ;;  %v491_v3 = vadd.f32 %v490_v30, %v475_v1  ;;  %v433_v40 = vmul.f32 0.6931472, %v795_v27  ;;  %v486_v1 = vld [vmem:[#allocation2] sm:$0xff] }
  0xab   : > { %vm1479_vm1 = vmand %vm350_vm14, %vm1647_vm7  ;;  %v449_v41 = vsub.f32 %v429_v22, %v284_v28  ;;  %v463_v42 = vmul.f32 %v447_v23, %v1288_v18  ;;  %v477_v44 = vsel %vm1466_vm6, %v461_v24, 0.0  ;;  %v324_v49 = vadd.s32 120, %v1284_v17  ;;  %v287_v17 = vld [vmem:[%s1211_s22 + $0x70] sm:$0xff] }
  0xac   : > { %v799_v47 = vpop.eup %798  ;;  %v339_v15 = vadd.s32 %v1293_v20, %v322_v29  ;;  %vm353_vm2 = vcmp.lt.s32.totalorder %v337_v10, 391  ;;  %vm1650_vm8 = vcmp.gt.f32.partialorder %v1288_v18, 0.0  ;;  %v492_v51 = vadd.f32 %v491_v3, %v476_v33 }
  0xad   : > { %vm1492_vm10 = vmand %vm351_vm0, %vm1650_vm8  ;;  %v435_v53 = vmul.f32 0.6931472, %v797_v34  ;;  %v450_v57 = vsub.f32 %v431_v31, %v285_v35  ;;  %v464_v38 = vmul.f32 %v448_v32, %v1297_v21  ;;  %v478_v4 = vsel %vm1479_vm1, %v462_v2, 0.0 }
  0xae   : > { %v340_v52 = vadd.s32 %v1293_v20, %v323_v37  ;;  %vm354_vm3 = vcmp.lt.s32.totalorder %v338_v13, 391  ;;  %vm1653_vm4 = vcmp.gt.f32.partialorder %v1297_v21, 0.0  ;;  %v493_v58 = vadd.f32 %v492_v51, %v477_v44 }
  0xaf   : > { %vm1504_vm12 = vmand %vm352_vm13, %vm1653_vm4  ;;  %v437_v59 = vmul.f32 0.6931472, %v799_v47  ;;  %v451_v60 = vsub.f32 %v433_v40, %v286_v48  ;;  %v465_v61 = vmul.f32 %v449_v41, %v1306_v26  ;;  %v479_v62 = vsel %vm1492_vm10, %v463_v42, 0.0 }
  0xb0   : > { %v341_v63 = vadd.s32 %v1293_v20, %v324_v49  ;;  %vm1656_vm14 = vcmp.gt.f32.partialorder %v1306_v26, 0.0  ;;  %v494_v5 = vadd.f32 %v493_v58, %v478_v4  ;;  %vm355_vm0 = vcmp.lt.s32.totalorder %v339_v15, 391 }
  0xb1   : > { %vm1516_vm5 = vmand %vm353_vm2, %vm1656_vm14  ;;  %v452_v56 = vsub.f32 %v435_v53, %v287_v17  ;;  %v466_v0 = vmul.f32 %v450_v57, %v1319_v36  ;;  %v480_v6 = vsel %vm1504_vm12, %v464_v38, 0.0  ;;  %vm1659_vm6 = vcmp.gt.f32.partialorder %v1319_v36, 0.0 }
  0xb2   : > { %vm1526_vm13 = vmand %vm354_vm3, %vm1659_vm6  ;;  %v495_v26 = vadd.f32 %v494_v5, %v479_v62  ;;  %vm356_vm7 = vcmp.lt.s32.totalorder %v340_v52, 391  ;;  %v453_v8 = vsub.f32 %v437_v59, %v288_v43  ;;  %v467_v9 = vmul.f32 %v451_v60, %v1335_v45 }
  0xb3   : > { %v481_v11 = vsel %vm1516_vm5, %v465_v61, 0.0  ;;  %vm387_vm1 = vmand %vm355_vm0, %vm371_vm15  ;;  %vm357_vm2 = vcmp.lt.s32.totalorder %v341_v63, 391  ;;  %v468_v36 = vmul.f32 %v452_v56, %v1348_v54  ;;  %v482_v14 = vsel %vm1526_vm13, %v466_v0, 0.0 }
  0xb4   : > { %v496_v12 = vadd.f32 %v495_v26, %v480_v6  ;;  %vm388_vm8 = vmand %vm356_vm7, %vm372_vm11  ;;  %v469_v7 = vmul.f32 %v453_v8, %v1351_v55  ;;  %v483_v16 = vsel %vm387_vm1, %v467_v9, 0.0 }
  0xb5   : > { %vm389_vm10 = vmand %vm357_vm2, %vm373_vm9  ;;  %v484_v45 = vsel %vm388_vm8, %v468_v36, 0.0 }
  0xb6   : > { %v497_v46 = vadd.f32 %v496_v12, %v481_v11  ;;  %v485_v23 = vsel %vm389_vm10, %v469_v7, 0.0 }
  0xb8   : > { %v498_v19 = vadd.f32 %v497_v46, %v482_v14 }
  0xba   : > { %v499_v22 = vadd.f32 %v498_v19, %v483_v16 }
  0xbc   : > { %v500_v24 = vadd.f32 %v499_v22, %v484_v45  ;;  %507 = sbr.rel (%p659_p9) target bundleno = 203 (0xcb), region = 44 }
  0xbe   : > { %v501_v27 = vadd.f32 %v500_v24, %v485_v23 }
  0xc0   : > { %v502_v28 = vadd.f32 %v501_v27, %v486_v1 }
  0xc2   : > { %503 = vst [vmem:[#allocation2] sm:$0xff] %v502_v28 }
  0xc9   : > { %v508_v54 = vld [vmem:[#allocation2] sm:$0xff] }
  0xca   : > { %509 = vst [vmem:[%s249_s23] sm:$0xff] %v508_v54 }
  0xcb PF: > { %s661_s27 = sshll.u32 %s970_s16, 7  ;;  %s524_s26 = sshll.u32 %s249_s23, 4  ;;  %s525_s26 = int_to_ptr.vmem [resolvable:$true] %s524_s26 }
  0xcc   : > { %s1550_s24 = scalar_lea.hbm %s1612_s2, %s661_s27  ;;  %s511_s15 = scalar_lea.sflag [#allocation5], %s247_s20 }
  0xcd   : > { %s856_s29 = scalar_lea.vmem %s525_s26, 128  ;;  %p1662_p12 = scmp.ne.s32.totalorder %s1629_s8, 0 }
  0xce   : > { %p857_p10 = scmp.ne.s32.totalorder %s525_s26, %s856_s29  ;;  %s991_s25 = smov [#allocation8]  }
  0xcf   : > { %s860_s22 = sshll.u32 %s991_s25, 4  ;;  %s861_s22 = int_to_ptr.vmem [resolvable:$false] %s860_s22 }
  0xd0   : > { %p858_p13 = pnand %p857_p10, %p1662_p12  ;;  %s862_s4 = scalar_lea.vmem %s861_s22, 256 }
  0xd1   : > { %p863_p2 = scmp.lt.s32.totalorder %s525_s26, %s861_s22  ;;  %p864_p3 = scmp.lt.s32.totalorder %s862_s4, %s856_s29 }
  0xd2   : > { %p859_p0 = pneg %p858_p13 }
  0xd3   : > { %p865_p7 = por %p864_p3, %p863_p2 }
  0xd5   : > { %p866_p1 = pnand %p865_p7, %p859_p0 }
  0xd7   : > { %869 = shalt.err (!%p866_p1)
}
  0xd8   : > { %s870_s16 = scalar_lea.hbm %s1550_s24, 128  ;;  %s874_s18 = scalar_lea.hbm %s1612_s2, 256 }
  0xd9   : > { %p871_p4 = scmp.ne.s32.totalorder %s1550_s24, %s870_s16  ;;  %p875_p8 = scmp.lt.u32.totalorder %s1550_s24, %s1612_s2 }
  0xda   : > { %p876_p5 = scmp.lt.u32.totalorder %s874_s18, %s870_s16  ;;  %p878_p10 = scmp.lt.u32.totalorder %s870_s16, %s1550_s24 }
  0xdb   : > { %p872_p11 = pnand %p871_p4, %p1662_p12 }
  0xdc   : > { %p877_p9 = por %p876_p5, %p875_p8 }
  0xdd   : > { %p873_p6 = pneg %p872_p11 }
  0xde   : > { %p879_p13 = por %p878_p10, %p877_p9 }
  0xe0   : > { %p880_p0 = pnand %p879_p13, %p873_p6 }
  0xe2   : > { %883 = shalt.err (!%p880_p0)
}
  0xe3   : > { %668 = dma.vmem_to_hbm [thread:$0]  (%p1662_p12), %s525_s26, 128, %s1550_s24, %s511_s15  }
  0xe4 PF: > { %p674_p2 = scmp.ge.s32.totalorder %s982_s19, 2  ;;  %s536_s6 = sand.u32 1, %s942_s9  }
  0xe5   : > { %p1663_p3 = scmp.ne.s32.totalorder %s1630_s12, 0  ;;  %s537_s28 = scalar_lea.sflag [#allocation5], %s536_s6 }
  0xe7   : > { %p671_p7 = pnand %p674_p2, %p1663_p3 }
  0xe9   : > { %937 = dma.done.wait (!%p671_p7), %s537_s28, 128  }
  0xea   : > { %939 = vsyncadd (!%p671_p7), %s537_s28, 4294967168  ;;  %s21_s19 = sadd.s32 1, %s982_s19   ;;  %s1664_s15 = sld [smem:[#allocation12_spill]] }
  0xeb   : > { %p18_p1 = scmp.ge.s32.totalorder %s21_s19, 6   ;;  %s1665_s16 = sld [smem:[#allocation13_spill]] }
  0xec   : > { %s1666_s17 = sld [smem:[#allocation14_spill]]  ;;  %s1667_s18 = sld [smem:[#allocation15_spill]] }
  0xed   : > { %s1668_s9 = smov %s946_s10  ;;  %s1669_s10 = smov %s950_s11 }
  0xee   : > { %s1670_s11 = smov %s1097_s5  ;;  %s1671_s12 = smov %s958_s13 }
  0xef   : > { %s1672_s13 = smov %s962_s14  ;;  %s1673_s14 = smov %s1109_s7 }
  0xf0   :  { %20 = sbr.rel (!%p18_p1) target bundleno = 11 (0xb), region = 94 }
  0xf7   :  { %542 = vsyncpa [#allocation4], 1 }
  0xf8   :  { %544 = vsyncpa [#allocation4 + $0x1], 1 }
  0xf9   :  { %545 = vsyncpa [#allocation7], 1 }
  0xfa   :  { %547 = vsyncpa [#allocation7 + $0x1], 1 }
  0xfb   :  { %548 = vsyncpa [#allocation5], 1 }
  0xfc   :  { %550 = vsyncpa [#allocation5 + $0x1], 1 }

</bundles_post_ra>
